<compile_context>
chip_gen: v6e
topology: v6e:2x2x1
jax: 0.10.0
libtpu: 0.0.40
codegen_flags: <defaults>
</compile_context>

<pallas_src>
import functools

import jax
import jax.numpy as jnp
from jax.experimental import pallas as pl
from jax.experimental.pallas import tpu as pltpu


# --------------------------------------------------------------------------- #
# Pallas matmul kernels with fused sigmoid epilogue                            #
# --------------------------------------------------------------------------- #

def _sigmoid_f32(x):
    # exp and approximate reciprocal both run on the EUP slot (free next to the
    # MXU / DMA); avoids the multi-op VALU Newton sequence of an f32 divide.
    return pl.reciprocal(1.0 + jnp.exp(-x), approx=True)


def _mm_single_k_kernel(a_ref, b_ref, o_ref, *, apply_sigmoid):
    # K fits in one block: no K grid axis, no accumulator scratch, no pl.when.
    acc = jnp.dot(a_ref[...], b_ref[...], preferred_element_type=jnp.float32)
    if apply_sigmoid:
        acc = _sigmoid_f32(acc)
    o_ref[...] = acc.astype(o_ref.dtype)


def _mm_multi_k_kernel(a_ref, b_ref, o_ref, acc_ref, *, apply_sigmoid):
    # Fallback for large 128-aligned K (not used by this module's shapes).
    @pl.when(pl.program_id(2) == 0)
    def _():
        acc_ref[...] = jnp.zeros_like(acc_ref)

    acc_ref[...] += jnp.dot(a_ref[...], b_ref[...],
                            preferred_element_type=jnp.float32)

    @pl.when(pl.program_id(2) == pl.num_programs(2) - 1)
    def _():
        acc = acc_ref[...]
        if apply_sigmoid:
            acc = _sigmoid_f32(acc)
        o_ref[...] = acc.astype(o_ref.dtype)


def _round_up(x, m):
    return (x + m - 1) // m * m


_VMEM_BUDGET = 20 * 1024 * 1024   # tile-selection budget (safe on every chip)
_VMEM_LIMIT = 32 * 1024 * 1024    # explicit scoped-VMEM limit (< v7x 64 MiB phys)


def pallas_matmul(a, b, *, apply_sigmoid=False, out_dtype=jnp.bfloat16,
                  compute_dtype=jnp.bfloat16):
    """(M, K) @ (K, N) with optional fused sigmoid.

    MXU inputs in `compute_dtype` (bf16 default, explicit precision knob), f32
    accumulation, output in `out_dtype`.  Tiles are sized from a VMEM budget.
    """
    M, K = a.shape
    K2, N = b.shape
    assert K == K2

    in_bytes = jnp.dtype(compute_dtype).itemsize
    out_bytes = jnp.dtype(out_dtype).itemsize

    # ---- K (reduction) blocking: full-dim block unless K is large & aligned. --
    if K % 128 == 0 and K > 512:
        tk = next(t for t in (512, 256, 128) if K % t == 0)
    else:
        tk = K                                   # full-dim block; K = 48 here
    grid_k = K // tk
    multi_k = grid_k > 1

    # ---- N (lane) blocking: full-dim block (Cout = 64) unless 128-aligned. ----
    if N % 128 == 0 and N > 256:
        tn = next(t for t in (256, 128) if N % t == 0)
    else:
        tn = N

    # ---- M (sublane) blocking: bf16 operands need sublane multiples of 16. ----
    Mp = _round_up(M, 16)
    if Mp != M:
        a = jnp.pad(a, ((0, Mp - M), (0, 0)))

    def _vmem_cost(tm):
        # Lane-padding aware (last dim pads to 128 lanes in VMEM).
        tk_pad = _round_up(tk, 128)
        tn_pad = _round_up(tn, 128)
        cost = 2 * tm * tk_pad * in_bytes        # a block, double-buffered
        cost += 2 * tk_pad * tn_pad * in_bytes   # b block, double-buffered
        cost += 2 * tm * tn_pad * out_bytes      # out block, double-buffered
        if multi_k:
            cost += tm * tn_pad * 4              # f32 accumulator scratch
        return cost

    cands = [t for t in (8192, 4096, 2048, 1024, 512, 256, 128, 64, 32, 16)
             if Mp % t == 0 and _vmem_cost(t) <= _VMEM_BUDGET]
    tm = cands[0] if cands else 16
    # Keep >= 2 grid steps along M when possible so the "parallel" M axis can be
    # sharded across v7x's two TensorCores (inert but harmless on v5e/v6e).
    if Mp // tm < 2:
        smaller = [t for t in cands if Mp // t >= 2]
        if smaller:
            tm = smaller[0]

    a = a.astype(compute_dtype)
    b = b.astype(compute_dtype)

    if multi_k:
        kern = functools.partial(_mm_multi_k_kernel, apply_sigmoid=apply_sigmoid)
        grid = (Mp // tm, N // tn, grid_k)
        in_specs = [pl.BlockSpec((tm, tk), lambda i, j, k: (i, k)),
                    pl.BlockSpec((tk, tn), lambda i, j, k: (k, j))]
        out_specs = pl.BlockSpec((tm, tn), lambda i, j, k: (i, j))
        scratch = [pltpu.VMEM((tm, tn), jnp.float32)]
        dims = ("parallel", "parallel", "arbitrary")
    else:
        kern = functools.partial(_mm_single_k_kernel, apply_sigmoid=apply_sigmoid)
        grid = (Mp // tm, N // tn)
        in_specs = [pl.BlockSpec((tm, K), lambda i, j: (i, 0)),
                    pl.BlockSpec((K, tn), lambda i, j: (0, j))]
        out_specs = pl.BlockSpec((tm, tn), lambda i, j: (i, j))
        scratch = []
        dims = ("parallel", "parallel")

    out = pl.pallas_call(
        kern,
        out_shape=jax.ShapeDtypeStruct((Mp, N), out_dtype),
        grid_spec=pltpu.PrefetchScalarGridSpec(
            num_scalar_prefetch=0,
            grid=grid,
            in_specs=in_specs,
            out_specs=out_specs,
            scratch_shapes=scratch),
        compiler_params=pltpu.CompilerParams(
            dimension_semantics=dims,
            vmem_limit_bytes=_VMEM_LIMIT),
    )(a, b)
    return out[:M] if Mp != M else out


# --------------------------------------------------------------------------- #
# Conv2d (no bias) + Sigmoid via im2col + fused Pallas matmul                  #
# --------------------------------------------------------------------------- #

def conv2d_sigmoid(x_nhwc, w, *, stride, pad, apply_sigmoid=True,
                   out_dtype=jnp.bfloat16, compute_dtype=jnp.bfloat16):
    """x: NHWC, w: torch Conv2d weight layout (Cout, Cin, kh, kw), no bias."""
    N, H, W, Cin = x_nhwc.shape
    Cout, Cin2, kh, kw = w.shape
    assert Cin == Cin2
    Ho = (H + 2 * pad - kh) // stride + 1
    Wo = (W + 2 * pad - kw) // stride + 1

    # im2col built in compute_dtype so the kh*kw-replicated patch tensor is half
    # the HBM bytes of an f32 im2col.
    # TODO(synk): for large spatial inputs move im2col into the kernel (manual
    # DMA of padded-input row windows + in-VMEM shifted reads) so HBM traffic is
    # bounded by true input+output bytes instead of kh*kw-replicated patches.
    xp = jnp.pad(x_nhwc, ((0, 0), (pad, pad), (pad, pad), (0, 0))).astype(compute_dtype)
    cols = []
    for i in range(kh):
        for j in range(kw):
            cols.append(xp[:, i:i + stride * (Ho - 1) + 1:stride,
                            j:j + stride * (Wo - 1) + 1:stride, :])
    patches = jnp.stack(cols, axis=3)              # (N, Ho, Wo, kh*kw, Cin)
    a = patches.reshape(N * Ho * Wo, kh * kw * Cin)
    wmat = jnp.transpose(w, (2, 3, 1, 0)).reshape(kh * kw * Cin, Cout)  # (kh,kw,Cin) order

    out = pallas_matmul(a, wmat, apply_sigmoid=apply_sigmoid,
                        out_dtype=out_dtype, compute_dtype=compute_dtype)
    return out.reshape(N, Ho, Wo, Cout)


# --------------------------------------------------------------------------- #
# OppoMaskConv module                                                          #
# --------------------------------------------------------------------------- #

def init_oppo_mask_conv(input_channels, output_channels, kernel_size,
                        mask_init=0.025):
    # nn.init.constant_(weight, maskInit); bias=False
    return jnp.full((output_channels, input_channels, kernel_size, kernel_size),
                    mask_init, jnp.float32)


def oppo_mask_conv_forward(weight, input_masks_nchw, *, stride, padding,
                           out_dtype=jnp.bfloat16):
    # NCHW interface for parity with the PyTorch module; internally NHWC so
    # channels ride the lane dimension.
    # TODO(synk): keep the surrounding model NHWC end-to-end to drop these two
    # transpose passes (they cost as much as the Pallas call at small shapes).
    x = jnp.transpose(input_masks_nchw, (0, 2, 3, 1))
    y = conv2d_sigmoid(x, weight, stride=stride, pad=padding, apply_sigmoid=True,
                       out_dtype=out_dtype)
    return jnp.transpose(y, (0, 3, 1, 2))                                  # NCHW


# --------------------------------------------------------------------------- #

if __name__ == "__main__":
    # OppoMaskConv(inputChannels=3, outputChannels=64, kernelSize=4, stride=2,
    #              padding=1, maskInit=0.04) -- as used in CombinedNet.
    N, CIN, COUT, K, STRIDE, PAD = 2, 3, 64, 4, 2, 1
    H = W = 16

    key = jax.random.PRNGKey(0)
    k_in, k_w = jax.random.split(key)
    input_masks = jax.random.uniform(k_in, (N, CIN, H, W), jnp.float32)
    weight = init_oppo_mask_conv(CIN, COUT, K, mask_init=0.04)

    fwd = jax.jit(functools.partial(oppo_mask_conv_forward,
                                    stride=STRIDE, padding=PAD))
    out = jax.block_until_ready(fwd(weight, input_masks))

    Ho = (H + 2 * PAD - K) // STRIDE + 1
    Wo = (W + 2 * PAD - K) // STRIDE + 1
    assert out.shape == (N, COUT, Ho, Wo), out.shape
    out_f32 = out.astype(jnp.float32)
    assert bool(jnp.all(jnp.isfinite(out_f32)))
    assert bool(jnp.all((out_f32 > 0.0) & (out_f32 < 1.0)))   # sigmoid range

    def ref_fwd(w, x):
        return jax.nn.sigmoid(jax.lax.conv_general_dilated(
            x, w, window_strides=(STRIDE, STRIDE),
            padding=[(PAD, PAD), (PAD, PAD)],
            dimension_numbers=("NCHW", "OIHW", "NCHW")))

    # Reference check with the module's constant weight.
    ref = ref_fwd(weight, input_masks)
    err = float(jnp.max(jnp.abs(out_f32 - ref)))
    assert err < 1e-2, err

    # Extra check with a non-constant weight (catches im2col / weight-layout
    # ordering bugs that constant weights would hide).
    w_rand = 0.05 * jax.random.normal(k_w, weight.shape, jnp.float32)
    out_r = jax.block_until_ready(fwd(w_rand, input_masks)).astype(jnp.float32)
    err_r = float(jnp.max(jnp.abs(out_r - ref_fwd(w_rand, input_masks))))
    assert err_r < 2e-2, err_r

    print("KERNEL_OK")
</pallas_src>

<mosaic_0001>
module attributes {stable_mosaic.version = 11 : i64} {
  func.func @_mm_single_k_kernel(%arg0: i32, %arg1: i32, %arg2: memref<64x48xbf16, #tpu.memory_space<vmem>>, %arg3: memref<48x64xbf16, #tpu.memory_space<vmem>>, %arg4: memref<64x64xbf16, #tpu.memory_space<vmem>>) attributes {dimension_semantics = [#tpu.dimension_semantics<parallel>, #tpu.dimension_semantics<parallel>], iteration_bounds = array<i64: 2, 1>, scalar_prefetch = 0 : i64, scratch_operands = 0 : i64, tpu.core_type = #tpu.core_type<tc>, window_params = [{transform_indices = @transform_0, window_bounds = array<i64: 64, 48>}, {transform_indices = @transform_1, window_bounds = array<i64: 48, 64>}, {transform_indices = @transform_2, window_bounds = array<i64: 64, 64>}]} {
    %c0 = arith.constant 0 : index
    %c0_0 = arith.constant 0 : index
    %0 = vector.load %arg2[%c0, %c0_0] : memref<64x48xbf16, #tpu.memory_space<vmem>>, vector<64x48xbf16>
    %c0_1 = arith.constant 0 : index
    %c0_2 = arith.constant 0 : index
    %1 = vector.load %arg3[%c0_1, %c0_2] : memref<48x64xbf16, #tpu.memory_space<vmem>>, vector<48x64xbf16>
    %cst = arith.constant dense<0.000000e+00> : vector<64x64xf32>
    %2 = tpu.matmul %0, %1, %cst {dimension_numbers = #tpu.dot_dimension_numbers<[1], [0], [0], [1], [0, 0, 1, 1], [], []>} : vector<64x48xbf16>, vector<48x64xbf16>, vector<64x64xf32> -> vector<64x64xf32>
    %cst_3 = arith.constant 0.000000e+00 : f32
    %3 = vector.broadcast %cst_3 : f32 to vector<64x64xf32>
    %4 = arith.subf %3, %2 : vector<64x64xf32>
    %5 = math.exp %4 : vector<64x64xf32>
    %cst_4 = arith.constant 1.000000e+00 : f32
    %6 = vector.broadcast %cst_4 : f32 to vector<64x64xf32>
    %7 = arith.addf %6, %5 : vector<64x64xf32>
    %8 = tpu.reciprocal %7 {approx = true} : vector<64x64xf32> -> vector<64x64xf32>
    %9 = arith.truncf %8 : vector<64x64xf32> to vector<64x64xbf16>
    %c0_5 = arith.constant 0 : index
    %c0_6 = arith.constant 0 : index
    %10 = vector.load %arg4[%c0_5, %c0_6] : memref<64x64xbf16, #tpu.memory_space<vmem>>, vector<64x64xbf16>
    tpu.vector_store %arg4[%c0_5, %c0_6], %9 {strides = array<i32>} : memref<64x64xbf16, #tpu.memory_space<vmem>>, vector<64x64xbf16>,
    return
  }
  func.func @transform_0(%arg0: i32, %arg1: i32) -> (i32, i32) {
    %c0_i32 = arith.constant 0 : i32
    %c0_i32_0 = arith.constant 0 : i32
    return %arg0, %c0_i32 : i32, i32
  }
  func.func @transform_1(%arg0: i32, %arg1: i32) -> (i32, i32) {
    %c0_i32 = arith.constant 0 : i32
    %c0_i32_0 = arith.constant 0 : i32
    return %c0_i32, %arg1 : i32, i32
  }
  func.func @transform_2(%arg0: i32, %arg1: i32) -> (i32, i32) {
    %c0_i32 = arith.constant 0 : i32
    return %arg0, %arg1 : i32, i32
  }
}

</mosaic_0001>

<bundles_post_ra>
// kernel: oppo_mask_conv_forward.1
= control target key start
LH: loop header
LB: loop body
LE: loop exit
PB: predicated region body
PF: predicated region fallthrough
CT: control target
= control target key end

     0   :  { %7 = vsyncpa [#allocation3], 0  ;;  %s885_s0 = inlined_call_operand.vmem [shape: bf16[128,48], index: 0, kind: input, shape index: {}]   ;;  %s886_s1 = inlined_call_operand.vmem [shape: bf16[48,64], index: 1, kind: input, shape index: {}]   ;;  %s887_s2 = inlined_call_operand.hbm [shape: bf16[128,64], index: 2, kind: output, shape index: {}]  }
   0x1   :  { %9 = vsyncpa [#allocation3 + $0x1], 0  ;;  %s751_s9 = smov 0   ;;  %s753_s10 = smov 0  }
   0x2   :  { %s755_s11 = smov 0   ;;  %s757_s12 = smov 0  }
   0x3   :  { %s759_s13 = smov 0   ;;  %s761_s14 = smov 0  }
   0x4 LB: > { %s490_s15 = sadd.s32 4294967295, %s731_s14   ;;  %s491_s16 = sadd.s32 4294967294, %s731_s14   ;;  %s731_s14 = sphi %s761_s14, %s15_s14   ;;  %s727_s13 = sphi %s759_s13, %s894_s13   ;;  %s723_s12 = sphi %s757_s12, %s893_s12   ;;  %s719_s11 = sphi %s755_s11, %s892_s11   ;;  %s715_s10 = sphi %s753_s10, %s891_s10   ;;  %s711_s9 = sphi %s751_s9, %s890_s9  }
   0x5   : > { %s27_s17 = sadd.s32 1, %s727_s13  ;;  %s88_s18 = sadd.s32 1, %s719_s11 }
   0x6   : > { %p29_p0 = scmp.ge.s32.totalorder %s27_s17, 2  ;;  %p98_p1 = scmp.ne.s32.totalorder %s719_s11, %s715_s10 }
   0x7   : > { %p99_p2 = scmp.eq.s32.totalorder %s490_s15, 1  ;;  %p104_p3 = scmp.ne.s32.totalorder %s715_s10, %s711_s9 }
   0x8   : > { %s896_s17 = smov (%p29_p0, %s27_s17), 0  ;;  %p105_p5 = scmp.eq.s32.totalorder %s491_s16, 1 }
   0x9   : > { %p791_p4 = por %p99_p2, %p98_p1  ;;  %s83_s20 = ssub.s32 %s727_s13, %s896_s17 }
   0xa   : > { %p495_p6 = scmp.ge.s32.totalorder %s731_s14, 1  ;;  %p86_p7 = scmp.eq.s32.totalorder %s83_s20, 0 }
   0xb   : > { %p798_p8 = por %p105_p5, %p104_p3  ;;  %p139_p9 = scmp.lt.s32.totalorder %s731_s14, 3 }
   0xc   : > { %s804_s22 = scalar_select %p86_p7, %s719_s11, %s88_s18  }
   0xd   : > { %p140_p10 = pnand %p495_p6, %p139_p9 }
   0xe   : > { %s497_s25 = sshll.u32 (!%p140_p10), %s723_s12, 3  ;;  %s162_s6 = sand.u32 (!%p140_p10), 1, %s715_s10  }
   0xf   : > { %143 = sbr.rel (%p140_p10) target bundleno = 283 (0x11b), region = 28  ;;  %p166_p11 = scmp.lt.s32.totalorder (!%p140_p10), %s497_s25, 15 }
  0x10   : > { %s496_s7 = sshll.u32 (!%p140_p10), %s162_s6, 5  ;;  %s531_s15 = sshll.u32 (!%p140_p10), %s723_s12, 9 }
  0x11   : > { %s164_s8 = scalar_lea.vmem (!%p140_p10), [#allocation2], %s496_s7  ;;  %s831_s23 = scalar_lea.hbm (!%p140_p10), %s887_s2, %s531_s15 }
  0x12   : > { %s403_s16 = sshll.u32 (!%p140_p10), %s164_s8, 4  ;;  %s840_s12 = scalar_lea.sflag (!%p140_p10), [#allocation3], %s162_s6  ;;  %s833_s16 = int_to_ptr.vmem [resolvable:$true] %s403_s16 }
  0x13   : > { %s655_s24 = scalar_lea.vmem (!%p140_p10), %s833_s16, 512 }
  0x14   : > { %v616_v0 = vld [vmem:[%s886_s1 + $0x10] sm:$0xff]   ;;  %v617_v1 = vld [vmem:[%s886_s1 + $0x8] sm:$0xff]   ;;  %s898_s25 = smov (!%p166_p11, %s497_s25), 15  ;;  %v618_v2 = vld [vmem:[%s886_s1] sm:$0xff]   ;;  %vm229_vm0 = vcmask 392192   ;;  %vm379_vm1 = vcmask 519168   ;;  %p656_p12 = scmp.ne.s32.totalorder %s833_s16, %s655_s24 }
  0x15   : > { %539 = vmatprep.subr.bf16.mxu0 %v616_v0  ;;  %553 = vmatprep.subr.bf16.mxu1 %v616_v0  ;;  %s498_s30 = sshll.u32 %s898_s25, 2  ;;  %s733_s25 = smov [#allocation2]  }
  0x16   : > { %540 = vmatpush3.bf16.msra.mxu0 %v616_v0  ;;  %556 = vmatpush3.bf16.msra.mxu1 %v616_v0  ;;  %s169_s5 = scalar_lea.vmem %s885_s0, %s498_s30  ;;  %p657_p13 = pnand %p656_p12, %p791_p4 }
  0x17   : > { %541 = vmatprep.subr.bf16.mxu0 %v617_v1  ;;  %554 = vmatprep.subr.bf16.mxu1 %v617_v1  ;;  %v619_v3 = vld [vmem:[%s169_s5] sm:$0xff]   ;;  %v620_v4 = vld [vmem:[%s169_s5 + $0x10] sm:$0xff]   ;;  %v621_v5 = vld [vmem:[%s169_s5 + $0x8] sm:$0xff]   ;;  %s659_s26 = sshll.u32 %s733_s25, 4  ;;  %s660_s26 = int_to_ptr.vmem [resolvable:$false] %s659_s26 }
  0x18   : > { %545 = vmatprep.mubr.msk.bf16.mxu0 %vm229_vm0, %v619_v3  ;;  %549 = vmatprep.mubr.msk.bf16.mxu1 %vm229_vm0, %v620_v4  ;;  %v622_v6 = vld [vmem:[%s169_s5 + $0x18] sm:$0xff]   ;;  %p658_p0 = pneg %p657_p13  ;;  %s661_s27 = scalar_lea.vmem %s660_s26, 1024 }
  0x19   : > { %p662_p1 = scmp.lt.s32.totalorder %s833_s16, %s660_s26  ;;  %p663_p2 = scmp.lt.s32.totalorder %s661_s27, %s655_s24 }
  0x1a   : > { %542 = vmatpush3.bf16.msra.mxu0 %v617_v1  ;;  %557 = vmatpush3.bf16.msra.mxu1 %v617_v1 }
  0x1b   : > { %543 = vmatprep.subr.bf16.mxu0 %v618_v2  ;;  %555 = vmatprep.subr.bf16.mxu1 %v618_v2  ;;  %p664_p3 = por %p663_p2, %p662_p1 }
  0x1d   : > { %p665_p5 = pnand %p664_p3, %p658_p0 }
  0x1e   : > { %544 = vmatpush3.bf16.msra.mxu0 %v618_v2  ;;  %558 = vmatpush3.bf16.msra.mxu1 %v618_v2 }
  0x21   : > { %546 = vmatmul.mubr.msk.bf16.vlgmr.msra.gmra.mxu0 %vm229_vm0, %v621_v5  ;;  %550 = vmatmul.mubr.msk.bf16.vlgmr.msra.gmra.mxu1 %vm229_vm0, %v622_v6 }
  0xe1   : > { %v547_v7 = vpop.f32.mrf.mxu0  ;;  %v551_v8 = vpop.f32.mrf.mxu1 }
  0xe2   : > { %v309_v9 = vsub.f32 0.0, %v547_v7  ;;  %v313_v10 = vsub.f32 0.0, %v551_v8 }
  0xe3   : > { %v276_v11 = vpop.f32.mrf.mxu0  ;;  %v292_v12 = vpop.f32.mrf.mxu1 }
  0xe4   : > { %v319_v13 = vmul.f32 1.442695, %v309_v9  ;;  %v327_v14 = vmul.f32 1.442695, %v313_v10  ;;  %v307_v15 = vsub.f32 0.0, %v276_v11  ;;  %v311_v16 = vsub.f32 0.0, %v292_v12 }
  0xe5   : > { %v548_v17 = vpop.f32.mrf.mxu0  ;;  %v552_v18 = vpop.f32.mrf.mxu1 }
  0xe6   : > { %623 = vpow2.f32 %v319_v13  ;;  %v315_v19 = vmul.f32 1.442695, %v307_v15  ;;  %v323_v20 = vmul.f32 1.442695, %v311_v16  ;;  %v310_v21 = vsub.f32 0.0, %v548_v17 }
  0xe7   : > { %625 = vpow2.f32 %v327_v14  ;;  %v314_v22 = vsub.f32 0.0, %v552_v18  ;;  %v279_v23 = vpop.f32.mrf.mxu0  ;;  %v295_v24 = vpop.f32.mrf.mxu1 }
  0xe8   : > { %627 = vpow2.f32 %v315_v19  ;;  %v321_v25 = vmul.f32 1.442695, %v310_v21  ;;  %v308_v26 = vsub.f32 0.0, %v279_v23  ;;  %v312_v27 = vsub.f32 0.0, %v295_v24 }
  0xe9   : > { %629 = vpow2.f32 %v323_v20  ;;  %v329_v28 = vmul.f32 1.442695, %v314_v22 }
  0xea   : > { %631 = vpow2.f32 %v321_v25  ;;  %v317_v29 = vmul.f32 1.442695, %v308_v26  ;;  %v325_v30 = vmul.f32 1.442695, %v312_v27 }
  0xeb   : > { %633 = vpow2.f32 %v329_v28 }
  0xec   : > { %635 = vpow2.f32 %v317_v29 }
  0xed   : > { %637 = vpow2.f32 %v325_v30 }
  0xf3   : > { %v624_v31 = vpop.eup %623 }
  0xf4   : > { %v626_v32 = vpop.eup %625  ;;  %v333_v33 = vadd.f32 1.0, %v624_v31 }
  0xf5   : > { %v628_v34 = vpop.eup %627  ;;  %v337_v35 = vadd.f32 1.0, %v626_v32 }
  0xf6   : > { %v630_v36 = vpop.eup %629  ;;  %639 = vrcp.f32 %v333_v33  ;;  %v331_v37 = vadd.f32 1.0, %v628_v34 }
  0xf7   : > { %v632_v38 = vpop.eup %631  ;;  %641 = vrcp.f32 %v337_v35  ;;  %v335_v39 = vadd.f32 1.0, %v630_v36 }
  0xf8   : > { %v634_v40 = vpop.eup %633  ;;  %643 = vrcp.f32 %v331_v37  ;;  %v334_v41 = vadd.f32 1.0, %v632_v38 }
  0xf9   : > { %v636_v42 = vpop.eup %635  ;;  %645 = vrcp.f32 %v335_v39  ;;  %v338_v43 = vadd.f32 1.0, %v634_v40 }
  0xfa   : > { %v638_v44 = vpop.eup %637  ;;  %647 = vrcp.f32 %v334_v41  ;;  %v332_v45 = vadd.f32 1.0, %v636_v42 }
  0xfb   : > { %649 = vrcp.f32 %v338_v43  ;;  %v336_v46 = vadd.f32 1.0, %v638_v44 }
  0xfc   : > { %651 = vrcp.f32 %v332_v45 }
  0xfd   : > { %653 = vrcp.f32 %v336_v46 }
 0x103   : > { %v640_v47 = vpop.eup %639 }
 0x104   : > { %v642_v48 = vpop.eup %641  ;;  %v525_v49 = vpack.c.bf16 %v640_v47, %v640_v47 }
 0x105   : > { %v644_v50 = vpop.eup %643  ;;  %v529_v51 = vpack.c.bf16 %v642_v48, %v642_v48 }
 0x106   : > { %v646_v52 = vpop.eup %645  ;;  %382 = vst.msk [vmem:[%s164_s8 + $0x8] sm:$0xf] %vm379_vm1, %v525_v49  ;;  %v523_v53 = vpack.c.bf16 %v644_v50, %v644_v50 }
 0x107   : > { %v648_v54 = vpop.eup %647  ;;  %386 = vst.msk [vmem:[%s164_s8 + $0x18] sm:$0xf] %vm379_vm1, %v529_v51  ;;  %v527_v55 = vpack.c.bf16 %v646_v52, %v646_v52 }
 0x108   : > { %v650_v56 = vpop.eup %649  ;;  %380 = vst.msk [vmem:[%s164_s8] sm:$0xf] %vm379_vm1, %v523_v53  ;;  %v526_v57 = vpack.c.bf16 %v648_v54, %v648_v54 }
 0x109   : > { %v652_v58 = vpop.eup %651  ;;  %384 = vst.msk [vmem:[%s164_s8 + $0x10] sm:$0xf] %vm379_vm1, %v527_v55  ;;  %v530_v59 = vpack.c.bf16 %v650_v56, %v650_v56 }
 0x10a   : > { %v654_v60 = vpop.eup %653  ;;  %383 = vst.msk [vmem:[%s164_s8 + $0xc] sm:$0xf] %vm379_vm1, %v526_v57  ;;  %v524_v61 = vpack.c.bf16 %v652_v58, %v652_v58 }
 0x10b   : > { %387 = vst.msk [vmem:[%s164_s8 + $0x1c] sm:$0xf] %vm379_vm1, %v530_v59  ;;  %v528_v62 = vpack.c.bf16 %v654_v60, %v654_v60 }
 0x10c   : > { %381 = vst.msk [vmem:[%s164_s8 + $0x4] sm:$0xf] %vm379_vm1, %v524_v61 }
 0x10d   : > { %385 = vst.msk [vmem:[%s164_s8 + $0x14] sm:$0xf] %vm379_vm1, %v528_v62 }
 0x10e   : > { %668 = shalt.err (!%p665_p5)
}
 0x10f   : > { %s669_s28 = scalar_lea.hbm %s831_s23, 512  ;;  %s673_s3 = scalar_lea.hbm %s887_s2, 1024 }
 0x110   : > { %p670_p6 = scmp.ne.s32.totalorder %s831_s23, %s669_s28  ;;  %p674_p10 = scmp.lt.s32.totalorder %s831_s23, %s887_s2 }
 0x111   : > { %p675_p11 = scmp.lt.s32.totalorder %s673_s3, %s669_s28 }
 0x112   : > { %p671_p7 = pnand %p670_p6, %p791_p4 }
 0x113   : > { %p676_p12 = por %p675_p11, %p674_p10 }
 0x114   : > { %p672_p9 = pneg %p671_p7 }
 0x116   : > { %p677_p13 = pnand %p676_p12, %p672_p9 }
 0x118   : > { %680 = shalt.err (!%p677_p13)
}
 0x119   : > { %s734_s6 = smov 64   ;;  %s735_s7 = smov 4  }
 0x11a   : > { %559 = dma.vmem_to_hbm [thread:$0]  (%p791_p4), %s833_s16, 512, %s831_s23, %s840_s12, %s734_s6, %s734_s6, %s735_s7  }
 0x11b PF: > { %p565_p0 = scmp.ge.s32.totalorder %s731_s14, 2  ;;  %s418_s8 = sand.u32 1, %s711_s9  }
 0x11c   : > { %s419_s15 = scalar_lea.sflag [#allocation3], %s418_s8 }
 0x11d   : > { %p562_p1 = pnand %p565_p0, %p798_p8 }
 0x11f   : > { %p563_p2 = pneg %p562_p1 }
 0x121   : > { %706 = dma.done.wait (%p563_p2), %s419_s15, 512  }
 0x122   : > { %708 = vsyncadd (%p563_p2), %s419_s15, 4294966784  ;;  %s15_s14 = sadd.s32 1, %s731_s14   ;;  %s890_s9 = smov %s715_s10 }
 0x123   : > { %p12_p3 = scmp.ge.s32.totalorder %s15_s14, 4   ;;  %s891_s10 = smov %s719_s11 }
 0x124   : > { %s892_s11 = smov %s804_s22  ;;  %s893_s12 = smov %s727_s13 }
 0x125   : > { %s894_s13 = smov %s896_s17  ;;  %14 = sbr.rel (!%p12_p3) target bundleno = 4 (0x4), region = 66 }
 0x12a   :  { %424 = vsyncpa [#allocation3], 1 }
 0x12b   :  { %426 = vsyncpa [#allocation3 + $0x1], 1 }

</bundles_post_ra>
